<compile_context>
chip_gen: v5e
topology: v5e:2x2
jax: 0.10.0
libtpu: 0.0.40
codegen_flags: <defaults>
</compile_context>

<pallas_src>
import jax
import jax.numpy as jnp
from jax import lax
from jax.experimental import pallas as pl
from jax.experimental.pallas import tpu as pltpu
import numpy as np

LANE = 128


def ecc_kernel(x_ref, src_ref, dst_ref, ea_ref, w1_ref, b1_ref, w2_ref, b2_ref,
               root_ref, bias_ref, exp_ref, red_ref, out_ref, acc_ref):
    eb = pl.program_id(0)
    n_eb = pl.num_programs(0)
    N = x_ref.shape[0]
    TE = ea_ref.shape[0]

    @pl.when(eb == 0)
    def _():
        acc_ref[...] = jnp.zeros_like(acc_ref)

    # ---- edge MLP: Linear -> ReLU -> Linear  => per-edge flattened weight (TE, H_pad)
    ea = ea_ref[...]
    h = jnp.dot(ea, w1_ref[...], preferred_element_type=jnp.float32) + b1_ref[...]
    h = jnp.maximum(h, 0.0)
    wflat = jnp.dot(h, w2_ref[...], preferred_element_type=jnp.float32) + b2_ref[...]

    # ---- gather x[src[e]] with a lane-dense (TE, N) one-hot (canonical MXU feed)
    src = src_ref[...]                                            # (TE, 1) int32
    iota_n = lax.broadcasted_iota(jnp.int32, (TE, N), 1)
    gather_en = (iota_n == src).astype(jnp.float32)               # (TE, N)
    x_src = jnp.dot(gather_en, x_ref[...],
                    preferred_element_type=jnp.float32)           # (TE, indim_pad)

    # ---- per-edge message on the MXU:
    #      m[e, o] = sum_k x_src[e, k] * wflat[e, k*outdim + o]
    x_rep = jnp.dot(x_src, exp_ref[...],
                    preferred_element_type=jnp.float32)           # (TE, H_pad)
    m = jnp.dot(x_rep * wflat, red_ref[...],
                preferred_element_type=jnp.float32)               # (TE, outdim_pad)

    # ---- scatter-add to destination nodes via (N, TE) one-hot (padded edges: dst=N -> zero column)
    dst = dst_ref[...]                                            # (1, TE) int32
    iota_nn = lax.broadcasted_iota(jnp.int32, (N, TE), 0)
    scatter_ne = (iota_nn == dst).astype(jnp.float32)             # (N, TE)
    acc_ref[...] += jnp.dot(scatter_ne, m, preferred_element_type=jnp.float32)

    # ---- finalize: root transform + bias, then BatchNorm1d (training stats) + ReLU
    @pl.when(eb == n_eb - 1)
    def _():
        pre = acc_ref[...] + jnp.dot(x_ref[...], root_ref[...],
                                     preferred_element_type=jnp.float32) + bias_ref[...]
        mean = jnp.mean(pre, axis=0, keepdims=True)
        var = jnp.mean((pre - mean) ** 2, axis=0, keepdims=True)
        y = (pre - mean) * lax.rsqrt(var + 1e-5)
        out_ref[...] = jnp.maximum(y, 0.0)


def _rpad(v, m):
    return ((v + m - 1) // m) * m


def ecc_forward(x, edge_index, edge_attr, params, *, block_e=128):
    N, indim = x.shape
    E, edge_dim = edge_attr.shape
    outdim = params["root"].shape[1]
    H = indim * outdim

    indim_p = _rpad(indim, LANE)
    outdim_p = _rpad(outdim, LANE)
    edge_dim_p = _rpad(edge_dim, LANE)
    H_p = _rpad(H, LANE)
    TE = _rpad(block_e, LANE)            # edge tile (lane/sublane friendly)
    E_p = _rpad(max(E, 1), TE)
    n_eb = E_p // TE

    f32 = jnp.float32

    def pad2(a, r, c):
        a = jnp.asarray(a, f32)
        return jnp.zeros((r, c), f32).at[:a.shape[0], :a.shape[1]].set(a)

    x_p = pad2(x, N, indim_p)
    ea_p = pad2(edge_attr, E_p, edge_dim_p)
    w1_p = pad2(params["w1"], edge_dim_p, H_p)
    b1_p = pad2(jnp.reshape(params["b1"], (1, -1)), 1, H_p)
    w2_p = pad2(params["w2"], H_p, H_p)
    b2_p = pad2(jnp.reshape(params["b2"], (1, -1)), 1, H_p)
    root_p = pad2(params["root"], indim_p, outdim_p)
    bias_p = pad2(jnp.reshape(params["bias"], (1, -1)), 1, outdim_p)

    # indices: src as a column (TE,1 blocks), dst as a row (1,TE blocks).
    # padded edges: src=0 (harmless), dst=N (scattered nowhere).
    src = jnp.zeros((E_p, 1), jnp.int32).at[:E, 0].set(edge_index[0].astype(jnp.int32))
    dst = jnp.full((1, E_p), N, jnp.int32).at[0, :E].set(edge_index[1].astype(jnp.int32))

    # constant 0/1 matrices for the message contraction (built once on host).
    j = np.arange(H_p)
    valid = j < H
    expand_np = np.zeros((indim_p, H_p), np.float32)
    expand_np[(j // outdim)[valid], j[valid]] = 1.0       # x_rep[:, k*outdim+o] = x_src[:, k]
    reduce_np = np.zeros((H_p, outdim_p), np.float32)
    reduce_np[j[valid], (j % outdim)[valid]] = 1.0        # sum over k for each o
    expand_mat = jnp.asarray(expand_np)
    reduce_mat = jnp.asarray(reduce_np)

    grid_spec = pltpu.PrefetchScalarGridSpec(
        num_scalar_prefetch=0,
        grid=(n_eb,),
        in_specs=[
            pl.BlockSpec((N, indim_p), lambda e: (0, 0)),         # x (resident)
            pl.BlockSpec((TE, 1), lambda e: (e, 0)),              # src indices
            pl.BlockSpec((1, TE), lambda e: (0, e)),              # dst indices
            pl.BlockSpec((TE, edge_dim_p), lambda e: (e, 0)),     # edge_attr tile
            pl.BlockSpec((edge_dim_p, H_p), lambda e: (0, 0)),    # w1
            pl.BlockSpec((1, H_p), lambda e: (0, 0)),             # b1
            pl.BlockSpec((H_p, H_p), lambda e: (0, 0)),           # w2
            pl.BlockSpec((1, H_p), lambda e: (0, 0)),             # b2
            pl.BlockSpec((indim_p, outdim_p), lambda e: (0, 0)),  # root
            pl.BlockSpec((1, outdim_p), lambda e: (0, 0)),        # bias
            pl.BlockSpec((indim_p, H_p), lambda e: (0, 0)),       # expand
            pl.BlockSpec((H_p, outdim_p), lambda e: (0, 0)),      # reduce
        ],
        out_specs=pl.BlockSpec((N, outdim_p), lambda e: (0, 0)),  # lane-dense output
        scratch_shapes=[pltpu.VMEM((N, outdim_p), jnp.float32)],  # node accumulator
    )

    out_p = pl.pallas_call(
        ecc_kernel,
        out_shape=jax.ShapeDtypeStruct((N, outdim_p), jnp.float32),
        grid_spec=grid_spec,
        compiler_params=pltpu.CompilerParams(
            dimension_semantics=("arbitrary",),        # edge axis is a reduction
            vmem_limit_bytes=32 * 1024 * 1024,         # safe on v5e/v6e/v7x
        ),
    )(x_p, src, dst, ea_p, w1_p, b1_p, w2_p, b2_p, root_p, bias_p,
      expand_mat, reduce_mat)
    return out_p[:, :outdim]


def ref_forward(x, edge_index, edge_attr, params, indim, outdim):
    # pure-JAX reference for correctness check
    h = jnp.maximum(edge_attr @ params["w1"] + params["b1"], 0.0)
    wflat = h @ params["w2"] + params["b2"]
    E = edge_attr.shape[0]
    W = wflat.reshape(E, indim, outdim)
    x_src = x[edge_index[0]]
    m = jnp.einsum("ek,eko->eo", x_src, W)
    agg = jnp.zeros((x.shape[0], outdim), jnp.float32).at[edge_index[1]].add(m)
    pre = agg + x @ params["root"] + params["bias"]
    mean = pre.mean(0, keepdims=True)
    var = ((pre - mean) ** 2).mean(0, keepdims=True)
    return jnp.maximum((pre - mean) * lax.rsqrt(var + 1e-5), 0.0)


if __name__ == "__main__":
    # small shapes; E > block_e so the multi-step edge grid / accumulator path is exercised
    N, E = 16, 200
    indim, outdim, edge_dim = 4, 8, 6
    H = indim * outdim

    key = jax.random.PRNGKey(0)
    ks = jax.random.split(key, 10)

    x = jax.random.normal(ks[0], (N, indim), jnp.float32)
    edge_index = jax.random.randint(ks[1], (2, E), 0, N, jnp.int32)
    edge_attr = jax.random.normal(ks[2], (E, edge_dim), jnp.float32)

    params = {
        "w1":   jax.random.normal(ks[3], (edge_dim, H), jnp.float32) * 0.2,
        "b1":   jax.random.normal(ks[4], (1, H), jnp.float32) * 0.1,
        "w2":   jax.random.normal(ks[5], (H, H), jnp.float32) * 0.1,
        "b2":   jax.random.normal(ks[6], (1, H), jnp.float32) * 0.1,
        "root": jax.random.normal(ks[7], (indim, outdim), jnp.float32) * 0.2,
        "bias": jax.random.normal(ks[8], (1, outdim), jnp.float32) * 0.1,
    }

    out = jax.block_until_ready(ecc_forward(x, edge_index, edge_attr, params, block_e=128))
    ref = jax.block_until_ready(ref_forward(x, edge_index, edge_attr, params, indim, outdim))

    assert out.shape == (N, outdim)
    np.testing.assert_allclose(np.asarray(out), np.asarray(ref), rtol=1e-3, atol=1e-3)

    print("KERNEL_OK")
</pallas_src>

<mosaic_0001>
module attributes {stable_mosaic.version = 11 : i64} {
  func.func @ecc_kernel(%arg0: i32, %arg1: memref<16x128xf32, #tpu.memory_space<vmem>>, %arg2: memref<128x1xi32, #tpu.memory_space<vmem>>, %arg3: memref<1x128xi32, #tpu.memory_space<vmem>>, %arg4: memref<128x128xf32, #tpu.memory_space<vmem>>, %arg5: memref<128x128xf32, #tpu.memory_space<vmem>>, %arg6: memref<1x128xf32, #tpu.memory_space<vmem>>, %arg7: memref<128x128xf32, #tpu.memory_space<vmem>>, %arg8: memref<1x128xf32, #tpu.memory_space<vmem>>, %arg9: memref<128x128xf32, #tpu.memory_space<vmem>>, %arg10: memref<1x128xf32, #tpu.memory_space<vmem>>, %arg11: memref<128x128xf32, #tpu.memory_space<vmem>>, %arg12: memref<128x128xf32, #tpu.memory_space<vmem>>, %arg13: memref<16x128xf32, #tpu.memory_space<vmem>>, %arg14: memref<16x128xf32, #tpu.memory_space<vmem>>) attributes {dimension_semantics = [#tpu.dimension_semantics<arbitrary>], iteration_bounds = array<i64: 2>, scalar_prefetch = 0 : i64, scratch_operands = 1 : i64, tpu.core_type = #tpu.core_type<tc>, window_params = [{pipeline_mode = #tpu.pipeline_mode<synchronous>, transform_indices = @transform_0, window_bounds = array<i64: 16, 128>}, {transform_indices = @transform_1, window_bounds = array<i64: 128, 1>}, {transform_indices = @transform_2, window_bounds = array<i64: 1, 128>}, {transform_indices = @transform_3, window_bounds = array<i64: 128, 128>}, {pipeline_mode = #tpu.pipeline_mode<synchronous>, transform_indices = @transform_4, window_bounds = array<i64: 128, 128>}, {pipeline_mode = #tpu.pipeline_mode<synchronous>, transform_indices = @transform_5, window_bounds = array<i64: 1, 128>}, {pipeline_mode = #tpu.pipeline_mode<synchronous>, transform_indices = @transform_6, window_bounds = array<i64: 128, 128>}, {pipeline_mode = #tpu.pipeline_mode<synchronous>, transform_indices = @transform_7, window_bounds = array<i64: 1, 128>}, {pipeline_mode = #tpu.pipeline_mode<synchronous>, transform_indices = @transform_8, window_bounds = array<i64: 128, 128>}, {pipeline_mode = #tpu.pipeline_mode<synchronous>, transform_indices = @transform_9, window_bounds = array<i64: 1, 128>}, {pipeline_mode = #tpu.pipeline_mode<synchronous>, transform_indices = @transform_10, window_bounds = array<i64: 128, 128>}, {pipeline_mode = #tpu.pipeline_mode<synchronous>, transform_indices = @transform_11, window_bounds = array<i64: 128, 128>}, {pipeline_mode = #tpu.pipeline_mode<synchronous>, transform_indices = @transform_12, window_bounds = array<i64: 16, 128>}]} {
    %c0_i32 = arith.constant 0 : i32
    %0 = arith.cmpi eq, %arg0, %c0_i32 : i32
    %1 = arith.extui %0 : i1 to i32
    %c0_i32_0 = arith.constant 0 : i32
    %2 = arith.cmpi ne, %1, %c0_i32_0 : i32
    scf.if %2 {
      %cst_31 = arith.constant 0.000000e+00 : f32
      %42 = vector.broadcast %cst_31 : f32 to vector<16x128xf32>
      %c0_32 = arith.constant 0 : index
      %c0_33 = arith.constant 0 : index
      %43 = vector.load %arg14[%c0_32, %c0_33] : memref<16x128xf32, #tpu.memory_space<vmem>>, vector<16x128xf32>
      tpu.vector_store %arg14[%c0_32, %c0_33], %42 {strides = array<i32>} : memref<16x128xf32, #tpu.memory_space<vmem>>, vector<16x128xf32>,
    } else {
    }
    %c0 = arith.constant 0 : index
    %c0_1 = arith.constant 0 : index
    %3 = vector.load %arg4[%c0, %c0_1] : memref<128x128xf32, #tpu.memory_space<vmem>>, vector<128x128xf32>
    %c0_2 = arith.constant 0 : index
    %c0_3 = arith.constant 0 : index
    %4 = vector.load %arg5[%c0_2, %c0_3] : memref<128x128xf32, #tpu.memory_space<vmem>>, vector<128x128xf32>
    %cst = arith.constant dense<0.000000e+00> : vector<128x128xf32>
    %5 = tpu.matmul %3, %4, %cst {dimension_numbers = #tpu.dot_dimension_numbers<[1], [0], [0], [1], [0, 0, 1, 1], [], []>} : vector<128x128xf32>, vector<128x128xf32>, vector<128x128xf32> -> vector<128x128xf32>
    %c0_4 = arith.constant 0 : index
    %c0_5 = arith.constant 0 : index
    %6 = vector.load %arg6[%c0_4, %c0_5] : memref<1x128xf32, #tpu.memory_space<vmem>>, vector<1x128xf32>
    %7 = vector.broadcast %6 : vector<1x128xf32> to vector<128x128xf32>
    %8 = arith.addf %5, %7 : vector<128x128xf32>
    %cst_6 = arith.constant 0.000000e+00 : f32
    %9 = vector.broadcast %cst_6 : f32 to vector<128x128xf32>
    %10 = arith.maximumf %8, %9 : vector<128x128xf32>
    %c0_7 = arith.constant 0 : index
    %c0_8 = arith.constant 0 : index
    %11 = vector.load %arg7[%c0_7, %c0_8] : memref<128x128xf32, #tpu.memory_space<vmem>>, vector<128x128xf32>
    %cst_9 = arith.constant dense<0.000000e+00> : vector<128x128xf32>
    %12 = tpu.matmul %10, %11, %cst_9 {dimension_numbers = #tpu.dot_dimension_numbers<[1], [0], [0], [1], [0, 0, 1, 1], [], []>} : vector<128x128xf32>, vector<128x128xf32>, vector<128x128xf32> -> vector<128x128xf32>
    %c0_10 = arith.constant 0 : index
    %c0_11 = arith.constant 0 : index
    %13 = vector.load %arg8[%c0_10, %c0_11] : memref<1x128xf32, #tpu.memory_space<vmem>>, vector<1x128xf32>
    %14 = vector.broadcast %13 : vector<1x128xf32> to vector<128x128xf32>
    %15 = arith.addf %12, %14 : vector<128x128xf32>
    %c0_12 = arith.constant 0 : index
    %c0_13 = arith.constant 0 : index
    %16 = vector.load %arg2[%c0_12, %c0_13] : memref<128x1xi32, #tpu.memory_space<vmem>>, vector<128x1xi32>
    %17 = tpu.iota {dimensions = array<i32: 1>} : vector<128x16xi32>
    %18 = vector.broadcast %16 : vector<128x1xi32> to vector<128x16xi32>
    %19 = arith.cmpi eq, %17, %18 : vector<128x16xi32>
    %20 = arith.extui %19 : vector<128x16xi1> to vector<128x16xi32>
    %21 = arith.sitofp %20 : vector<128x16xi32> to vector<128x16xf32>
    %c0_14 = arith.constant 0 : index
    %c0_15 = arith.constant 0 : index
    %22 = vector.load %arg1[%c0_14, %c0_15] : memref<16x128xf32, #tpu.memory_space<vmem>>, vector<16x128xf32>
    %cst_16 = arith.constant dense<0.000000e+00> : vector<128x128xf32>
    %23 = tpu.matmul %21, %22, %cst_16 {dimension_numbers = #tpu.dot_dimension_numbers<[1], [0], [0], [1], [0, 0, 1, 1], [], []>} : vector<128x16xf32>, vector<16x128xf32>, vector<128x128xf32> -> vector<128x128xf32>
    %c0_17 = arith.constant 0 : index
    %c0_18 = arith.constant 0 : index
    %24 = vector.load %arg11[%c0_17, %c0_18] : memref<128x128xf32, #tpu.memory_space<vmem>>, vector<128x128xf32>
    %cst_19 = arith.constant dense<0.000000e+00> : vector<128x128xf32>
    %25 = tpu.matmul %23, %24, %cst_19 {dimension_numbers = #tpu.dot_dimension_numbers<[1], [0], [0], [1], [0, 0, 1, 1], [], []>} : vector<128x128xf32>, vector<128x128xf32>, vector<128x128xf32> -> vector<128x128xf32>
    %26 = arith.mulf %25, %15 : vector<128x128xf32>
    %c0_20 = arith.constant 0 : index
    %c0_21 = arith.constant 0 : index
    %27 = vector.load %arg12[%c0_20, %c0_21] : memref<128x128xf32, #tpu.memory_space<vmem>>, vector<128x128xf32>
    %cst_22 = arith.constant dense<0.000000e+00> : vector<128x128xf32>
    %28 = tpu.matmul %26, %27, %cst_22 {dimension_numbers = #tpu.dot_dimension_numbers<[1], [0], [0], [1], [0, 0, 1, 1], [], []>} : vector<128x128xf32>, vector<128x128xf32>, vector<128x128xf32> -> vector<128x128xf32>
    %c0_23 = arith.constant 0 : index
    %c0_24 = arith.constant 0 : index
    %29 = vector.load %arg3[%c0_23, %c0_24] : memref<1x128xi32, #tpu.memory_space<vmem>>, vector<1x128xi32>
    %30 = tpu.iota {dimensions = array<i32: 0>} : vector<16x128xi32>
    %31 = vector.broadcast %29 : vector<1x128xi32> to vector<16x128xi32>
    %32 = arith.cmpi eq, %30, %31 : vector<16x128xi32>
    %33 = arith.extui %32 : vector<16x128xi1> to vector<16x128xi32>
    %34 = arith.sitofp %33 : vector<16x128xi32> to vector<16x128xf32>
    %c0_25 = arith.constant 0 : index
    %c0_26 = arith.constant 0 : index
    %35 = vector.load %arg14[%c0_25, %c0_26] : memref<16x128xf32, #tpu.memory_space<vmem>>, vector<16x128xf32>
    %cst_27 = arith.constant dense<0.000000e+00> : vector<16x128xf32>
    %36 = tpu.matmul %34, %28, %cst_27 {dimension_numbers = #tpu.dot_dimension_numbers<[1], [0], [0], [1], [0, 0, 1, 1], [], []>} : vector<16x128xf32>, vector<128x128xf32>, vector<16x128xf32> -> vector<16x128xf32>
    %37 = arith.addf %35, %36 : vector<16x128xf32>
    %c0_28 = arith.constant 0 : index
    %c0_29 = arith.constant 0 : index
    %38 = vector.load %arg14[%c0_28, %c0_29] : memref<16x128xf32, #tpu.memory_space<vmem>>, vector<16x128xf32>
    tpu.vector_store %arg14[%c0_28, %c0_29], %37 {strides = array<i32>} : memref<16x128xf32, #tpu.memory_space<vmem>>, vector<16x128xf32>,
    %c1_i32 = arith.constant 1 : i32
    %39 = arith.cmpi eq, %arg0, %c1_i32 : i32
    %40 = arith.extui %39 : i1 to i32
    %c0_i32_30 = arith.constant 0 : i32
    %41 = arith.cmpi ne, %40, %c0_i32_30 : i32
    scf.if %41 {
      %c0_31 = arith.constant 0 : index
      %c0_32 = arith.constant 0 : index
      %42 = vector.load %arg14[%c0_31, %c0_32] : memref<16x128xf32, #tpu.memory_space<vmem>>, vector<16x128xf32>
      %c0_33 = arith.constant 0 : index
      %c0_34 = arith.constant 0 : index
      %43 = vector.load %arg1[%c0_33, %c0_34] : memref<16x128xf32, #tpu.memory_space<vmem>>, vector<16x128xf32>
      %c0_35 = arith.constant 0 : index
      %c0_36 = arith.constant 0 : index
      %44 = vector.load %arg9[%c0_35, %c0_36] : memref<128x128xf32, #tpu.memory_space<vmem>>, vector<128x128xf32>
      %cst_37 = arith.constant dense<0.000000e+00> : vector<16x128xf32>
      %45 = tpu.matmul %43, %44, %cst_37 {dimension_numbers = #tpu.dot_dimension_numbers<[1], [0], [0], [1], [0, 0, 1, 1], [], []>} : vector<16x128xf32>, vector<128x128xf32>, vector<16x128xf32> -> vector<16x128xf32>
      %46 = arith.addf %42, %45 : vector<16x128xf32>
      %c0_38 = arith.constant 0 : index
      %c0_39 = arith.constant 0 : index
      %47 = vector.load %arg10[%c0_38, %c0_39] : memref<1x128xf32, #tpu.memory_space<vmem>>, vector<1x128xf32>
      %48 = vector.broadcast %47 : vector<1x128xf32> to vector<16x128xf32>
      %49 = arith.addf %46, %48 : vector<16x128xf32>
      %cst_40 = arith.constant dense<0.000000e+00> : vector<128xf32>
      %50 = vector.multi_reduction <add>, %49, %cst_40 [0] : vector<16x128xf32> to vector<128xf32>
      %51 = vector.shape_cast %50 : vector<128xf32> to vector<1x128xf32>
      %cst_41 = arith.constant 1.600000e+01 : f32
      %52 = vector.broadcast %cst_41 : f32 to vector<1x128xf32>
      %53 = arith.divf %51, %52 : vector<1x128xf32>
      %54 = vector.broadcast %53 : vector<1x128xf32> to vector<16x128xf32>
      %55 = arith.subf %49, %54 : vector<16x128xf32>
      %56 = arith.mulf %55, %55 : vector<16x128xf32>
      %cst_42 = arith.constant dense<0.000000e+00> : vector<128xf32>
      %57 = vector.multi_reduction <add>, %56, %cst_42 [0] : vector<16x128xf32> to vector<128xf32>
      %58 = vector.shape_cast %57 : vector<128xf32> to vector<1x128xf32>
      %cst_43 = arith.constant 1.600000e+01 : f32
      %59 = vector.broadcast %cst_43 : f32 to vector<1x128xf32>
      %60 = arith.divf %58, %59 : vector<1x128xf32>
      %61 = vector.broadcast %53 : vector<1x128xf32> to vector<16x128xf32>
      %62 = arith.subf %49, %61 : vector<16x128xf32>
      %cst_44 = arith.constant 9.99999974E-6 : f32
      %63 = vector.broadcast %cst_44 : f32 to vector<1x128xf32>
      %64 = arith.addf %60, %63 : vector<1x128xf32>
      %65 = math.rsqrt %64 : vector<1x128xf32>
      %66 = vector.broadcast %65 : vector<1x128xf32> to vector<16x128xf32>
      %67 = arith.mulf %62, %66 : vector<16x128xf32>
      %cst_45 = arith.constant 0.000000e+00 : f32
      %68 = vector.broadcast %cst_45 : f32 to vector<16x128xf32>
      %69 = arith.maximumf %67, %68 : vector<16x128xf32>
      %c0_46 = arith.constant 0 : index
      %c0_47 = arith.constant 0 : index
      %70 = vector.load %arg13[%c0_46, %c0_47] : memref<16x128xf32, #tpu.memory_space<vmem>>, vector<16x128xf32>
      tpu.vector_store %arg13[%c0_46, %c0_47], %69 {strides = array<i32>} : memref<16x128xf32, #tpu.memory_space<vmem>>, vector<16x128xf32>,
    } else {
    }
    return
  }
  func.func @transform_0(%arg0: i32) -> (i32, i32) {
    %c0_i32 = arith.constant 0 : i32
    %c0_i32_0 = arith.constant 0 : i32
    %c0_i32_1 = arith.constant 0 : i32
    return %c0_i32, %c0_i32_0 : i32, i32
  }
  func.func @transform_1(%arg0: i32) -> (i32, i32) {
    %c0_i32 = arith.constant 0 : i32
    %c0_i32_0 = arith.constant 0 : i32
    return %arg0, %c0_i32 : i32, i32
  }
  func.func @transform_2(%arg0: i32) -> (i32, i32) {
    %c0_i32 = arith.constant 0 : i32
    %c0_i32_0 = arith.constant 0 : i32
    return %c0_i32, %arg0 : i32, i32
  }
  func.func @transform_3(%arg0: i32) -> (i32, i32) {
    %c0_i32 = arith.constant 0 : i32
    %c0_i32_0 = arith.constant 0 : i32
    return %arg0, %c0_i32 : i32, i32
  }
  func.func @transform_4(%arg0: i32) -> (i32, i32) {
    %c0_i32 = arith.constant 0 : i32
    %c0_i32_0 = arith.constant 0 : i32
    %c0_i32_1 = arith.constant 0 : i32
    return %c0_i32, %c0_i32_0 : i32, i32
  }
  func.func @transform_5(%arg0: i32) -> (i32, i32) {
    %c0_i32 = arith.constant 0 : i32
    %c0_i32_0 = arith.constant 0 : i32
    %c0_i32_1 = arith.constant 0 : i32
    return %c0_i32, %c0_i32_0 : i32, i32
  }
  func.func @transform_6(%arg0: i32) -> (i32, i32) {
    %c0_i32 = arith.constant 0 : i32
    %c0_i32_0 = arith.constant 0 : i32
    %c0_i32_1 = arith.constant 0 : i32
    return %c0_i32, %c0_i32_0 : i32, i32
  }
  func.func @transform_7(%arg0: i32) -> (i32, i32) {
    %c0_i32 = arith.constant 0 : i32
    %c0_i32_0 = arith.constant 0 : i32
    %c0_i32_1 = arith.constant 0 : i32
    return %c0_i32, %c0_i32_0 : i32, i32
  }
  func.func @transform_8(%arg0: i32) -> (i32, i32) {
    %c0_i32 = arith.constant 0 : i32
    %c0_i32_0 = arith.constant 0 : i32
    %c0_i32_1 = arith.constant 0 : i32
    return %c0_i32, %c0_i32_0 : i32, i32
  }
  func.func @transform_9(%arg0: i32) -> (i32, i32) {
    %c0_i32 = arith.constant 0 : i32
    %c0_i32_0 = arith.constant 0 : i32
    %c0_i32_1 = arith.constant 0 : i32
    return %c0_i32, %c0_i32_0 : i32, i32
  }
  func.func @transform_10(%arg0: i32) -> (i32, i32) {
    %c0_i32 = arith.constant 0 : i32
    %c0_i32_0 = arith.constant 0 : i32
    %c0_i32_1 = arith.constant 0 : i32
    return %c0_i32, %c0_i32_0 : i32, i32
  }
  func.func @transform_11(%arg0: i32) -> (i32, i32) {
    %c0_i32 = arith.constant 0 : i32
    %c0_i32_0 = arith.constant 0 : i32
    %c0_i32_1 = arith.constant 0 : i32
    return %c0_i32, %c0_i32_0 : i32, i32
  }
  func.func @transform_12(%arg0: i32) -> (i32, i32) {
    %c0_i32 = arith.constant 0 : i32
    %c0_i32_0 = arith.constant 0 : i32
    %c0_i32_1 = arith.constant 0 : i32
    return %c0_i32, %c0_i32_0 : i32, i32
  }
}

</mosaic_0001>

<bundles_post_ra>
// kernel: tpu_custom_call.1
= control target key start
LH: loop header
LB: loop body
LE: loop exit
PB: predicated region body
PF: predicated region fallthrough
CT: control target
= control target key end

     0   :  { %s2209_s0 = inlined_call_operand.hbm [shape: f32[16,128], index: 0, kind: input, shape index: {}]   ;;  %s2210_s1 = inlined_call_operand.vmem [shape: s32[256,1], index: 1, kind: input, shape index: {}]   ;;  %s2211_s2 = inlined_call_operand.vmem [shape: s32[1,256], index: 2, kind: input, shape index: {}]   ;;  %s2212_s3 = inlined_call_operand.vmem [shape: f32[256,128], index: 3, kind: input, shape index: {}]   ;;  %s2213_s4 = inlined_call_operand.hbm [shape: f32[128,128], index: 4, kind: input, shape index: {}]   ;;  %s2214_s5 = inlined_call_operand.vmem [shape: f32[1,128], index: 5, kind: input, shape index: {}]   ;;  %s2215_s6 = inlined_call_operand.hbm [shape: f32[128,128], index: 6, kind: input, shape index: {}]   ;;  %s2216_s7 = inlined_call_operand.vmem [shape: f32[1,128], index: 7, kind: input, shape index: {}]   ;;  %s2217_s8 = inlined_call_operand.hbm [shape: f32[128,128], index: 8, kind: input, shape index: {}]   ;;  %s2218_s9 = inlined_call_operand.vmem [shape: f32[1,128], index: 9, kind: input, shape index: {}]   ;;  %s2219_s10 = inlined_call_operand.hbm [shape: f32[128,128], index: 10, kind: input, shape index: {}]   ;;  %s2220_s11 = inlined_call_operand.hbm [shape: f32[128,128], index: 11, kind: input, shape index: {}]   ;;  %s2221_s12 = inlined_call_operand.hbm [shape: f32[16,128], index: 12, kind: output, shape index: {}]  }
   0x1   :  { %2222 = sst [smem:[#allocation20_spill]] %s2209_s0 }
   0x2   :  { %17 = vsyncpa [#allocation4], 0 }
   0x3   :  { %18 = vsyncpa [#allocation7], 0 }
   0x4   :  { %19 = vsyncpa [#allocation10], 0 }
   0x5   :  { %20 = vsyncpa [#allocation13], 0 }
   0x6   :  { %21 = vsyncpa [#allocation5], 0  ;;  %s1935_s21 = smov 0  }
   0x7 LB: > { %s1941_s22 = sadd.s32 4294967295, %s1852_s21   ;;  %p1425_p0 = scmp.ge.s32.totalorder %s1852_s21, 1  ;;  %s1852_s21 = sphi %s1935_s21, %s27_s21  }
   0x8   : > { %p320_p1 = scmp.lt.s32.totalorder %s1852_s21, 3  ;;  %p1426_p2 = scmp.ne.s32.totalorder %s1941_s22, 0 }
   0x9   : > { %p1569_p3 = scmp.eq.s32.totalorder %s1941_s22, 0  ;;  %s345_s25 = sshll.u32 %s2213_s4, 4  ;;  %s346_s25 = int_to_ptr.hbm [resolvable:$true] %s345_s25 }
   0xa   : > { %p1950_p4 = pnand %p1425_p0, %p320_p1  ;;  %s379_s29 = sshll.u32 %s2217_s8, 4  ;;  %s380_s29 = int_to_ptr.hbm [resolvable:$true] %s379_s29 }
   0xb   : > { %s1854_s30 = smov [#allocation6]   ;;  %s1855_s15 = smov [#allocation9]  }
   0xc   : > { %p1550_p5 = pneg %p1950_p4  ;;  %s347_s13 = sshll.u32 %s1854_s30, 4  ;;  %s348_s13 = int_to_ptr.vmem [resolvable:$true] %s347_s13 }
   0xd   : > { %s381_s16 = sshll.u32 %s1855_s15, 4  ;;  %s2225_s0 = sld [smem:[#allocation20_spill]]  ;;  %s382_s16 = int_to_ptr.vmem [resolvable:$true] %s381_s16 }
   0xe   : > { %p1961_p6 = pnand %p1569_p3, %p1550_p5  ;;  %s1856_s20 = smov 128  }
   0xf   : > { %s1857_s23 = smov 8   ;;  %s1858_s24 = smov [#allocation3]  }
  0x10   : > { %1556 = dma.hbm_to_vmem [thread:$0]  (!%p1961_p6), %s346_s25, 2048, %s348_s13, [#allocation7], %s1856_s20, %s1856_s20, %s1857_s23  }
  0x11   : > { %1562 = dma.hbm_to_vmem [thread:$0]  (!%p1961_p6), %s380_s29, 2048, %s382_s16, [#allocation10], %s1856_s20, %s1856_s20, %s1857_s23  }
  0x12   : > { %s333_s27 = sshll.u32 %s1858_s24, 4  ;;  %s362_s15 = sshll.u32 %s2215_s6, 4  ;;  %s334_s27 = int_to_ptr.vmem [resolvable:$true] %s333_s27  ;;  %s363_s15 = int_to_ptr.hbm [resolvable:$true] %s362_s15 }
  0x13   : > { %s331_s19 = sshll.u32 %s2225_s0, 4  ;;  %s396_s0 = sshll.u32 %s2219_s10, 4  ;;  %s332_s19 = int_to_ptr.hbm [resolvable:$true] %s331_s19  ;;  %s397_s0 = int_to_ptr.hbm [resolvable:$true] %s396_s0 }
  0x14   : > { %1553 = dma.hbm_to_vmem [thread:$0]  (!%p1961_p6), %s332_s19, 256, %s334_s27, [#allocation4], %s1856_s20, %s1856_s20, %s1857_s23  }
  0x15   : > { %s1859_s25 = smov [#allocation8]   ;;  %s1860_s29 = smov [#allocation11]  }
  0x16   : > { %s364_s13 = sshll.u32 %s1859_s25, 4  ;;  %s398_s16 = sshll.u32 %s1860_s29, 4  ;;  %s365_s13 = int_to_ptr.vmem [resolvable:$true] %s364_s13  ;;  %s399_s16 = int_to_ptr.vmem [resolvable:$true] %s398_s16 }
  0x17   : > { %1559 = dma.hbm_to_vmem [thread:$0]  (!%p1961_p6), %s363_s15, 2048, %s365_s13, [#allocation7], %s1856_s20, %s1856_s20, %s1857_s23  }
  0x18   : > { %s410_s30 = sshll.u32 %s2220_s11, 4  ;;  %s1861_s19 = smov [#allocation12]   ;;  %s411_s30 = int_to_ptr.hbm [resolvable:$true] %s410_s30 }
  0x19   : > { %1565 = dma.hbm_to_vmem [thread:$0]  (!%p1961_p6), %s397_s0, 2048, %s399_s16, [#allocation10], %s1856_s20, %s1856_s20, %s1857_s23  }
  0x1a   : > { %s412_s27 = sshll.u32 %s1861_s19, 4  ;;  %452 = sbr.rel (%p1950_p4) target bundleno = 1247 (0x4df), region = 68  ;;  %s413_s27 = int_to_ptr.vmem [resolvable:$true] %s412_s27 }
  0x1b   : > { %1568 = dma.hbm_to_vmem [thread:$0]  (!%p1961_p6), %s411_s30, 2048, %s413_s27, [#allocation13], %s1856_s20, %s1856_s20, %s1857_s23  }
  0x1f   : > { %1831 = dma.done.wait (%p1569_p3), [#allocation4], 256  }
  0x20   : > { %1833 = vsyncadd (%p1569_p3), [#allocation4], 4294967040 }
  0x21   : > { %1835 = dma.done.wait (%p1569_p3), [#allocation7], 4096  }
  0x22   : > { %1837 = vsyncadd (%p1569_p3), [#allocation7], 4294963200 }
  0x23   : > { %1839 = dma.done.wait (%p1569_p3), [#allocation10], 4096  }
  0x24   : > { %1841 = vsyncadd (%p1569_p3), [#allocation10], 4294963200 }
  0x25   : > { %1843 = dma.done.wait (%p1569_p3), [#allocation13], 2048  }
  0x26   : > { %1845 = vsyncadd (%p1569_p3), [#allocation13], 4294965248  ;;  %s1440_s0 = sshll.u32 %s1941_s22, 4  ;;  %p529_p7 = scmp.lt.s32.totalorder %s1941_s22, 1 }
  0x27   : > { %p524_p8 = scmp.lt.s32.totalorder %s1440_s0, 31  ;;  %541 = sbr.rel (%p1426_p2) target bundleno = 47 (0x2f), region = 96 }
  0x28   : > { %s2010_s26 = scalar_select %p529_p7, %s1941_s22, 1 }
  0x29   : > { %s2227_s0 = smov (!%p524_p8, %s1440_s0), 31 }
  0x2a   : > { %s531_s23 = scalar_lea.vmem %s2211_s2, %s2010_s26  ;;  %s1441_s15 = sshll.u32 %s2227_s0, 3 }
  0x2b   : > { %s2019_s25 = scalar_lea.vmem %s2210_s1, %s1441_s15  ;;  %s2024_s16 = scalar_lea.vmem %s2212_s3, %s1441_s15 }
  0x2c   : > { %v1862_v0 = vmov 0.0  }
  0x2d   : > { %542 = vst [vmem:[#allocation2] sm:$0xff] %v1862_v0 }
  0x2e   : > { %543 = vst [vmem:[#allocation2 + $0x8] sm:$0xff] %v1862_v0 }
  0x2f PF: > { %v575_v1 = vld [vmem:[#allocation6 + $0x78] sm:$0xff]  ;;  %v574_v2 = vld [vmem:[#allocation6 + $0x70] sm:$0xff]  ;;  %v573_v3 = vld [vmem:[#allocation6 + $0x68] sm:$0xff]  ;;  %v1863_v26 = vmov 0   ;;  %vm862_vm4 = vcmask 130048   ;;  %p1481_p9 = scmp.ne.s32.totalorder %s1941_s22, 1 }
  0x30   : > { %580 = vmatpush.msra.mxu0 %v575_v1  ;;  %v572_v4 = vld [vmem:[#allocation6 + $0x60] sm:$0xff]  ;;  %v571_v5 = vld [vmem:[#allocation6 + $0x58] sm:$0xff]  ;;  %v570_v6 = vld [vmem:[#allocation6 + $0x50] sm:$0xff]  ;;  %1608 = vset.pattern.permute.xlu1 %v1863_v26 }
  0x31   : > { %v569_v7 = vld [vmem:[#allocation6 + $0x48] sm:$0xff]  ;;  %v568_v8 = vld [vmem:[#allocation6 + $0x40] sm:$0xff]  ;;  %v567_v9 = vld [vmem:[#allocation6 + $0x38] sm:$0xff]  ;;  %1607 = vset.pattern.permute.xlu0 %v1863_v26  ;;  %1609 = vset.pattern.permute.xlu2 %v1863_v26 }
  0x32   : > { %581 = vmatpush.msra.mxu0 %v574_v2  ;;  %v566_v10 = vld [vmem:[#allocation6 + $0x30] sm:$0xff]  ;;  %v565_v11 = vld [vmem:[#allocation6 + $0x28] sm:$0xff]  ;;  %v564_v12 = vld [vmem:[#allocation6 + $0x20] sm:$0xff] }
  0x33   : > { %v563_v13 = vld [vmem:[#allocation6 + $0x18] sm:$0xff]  ;;  %v562_v14 = vld [vmem:[#allocation6 + $0x10] sm:$0xff]  ;;  %v561_v15 = vld [vmem:[#allocation6 + $0x8] sm:$0xff] }
  0x34   : > { %582 = vmatpush.msra.mxu0 %v573_v3  ;;  %v560_v16 = vld [vmem:[#allocation6] sm:$0xff]  ;;  %v545_v18 = vld [vmem:[%s2024_s16 + $0x8] sm:$0xff]  ;;  %v546_v19 = vld [vmem:[%s2024_s16 + $0x10] sm:$0xff] }
  0x35   : > { %v544_v17 = vld [vmem:[%s2024_s16] sm:$0xff]  ;;  %v547_v20 = vld [vmem:[%s2024_s16 + $0x18] sm:$0xff]  ;;  %v549_v22 = vld [vmem:[%s2024_s16 + $0x28] sm:$0xff] }
  0x36   : > { %583 = vmatpush.msra.mxu0 %v572_v4  ;;  %v548_v21 = vld [vmem:[%s2024_s16 + $0x20] sm:$0xff]  ;;  %v550_v23 = vld [vmem:[%s2024_s16 + $0x30] sm:$0xff]  ;;  %v551_v27 = vld [vmem:[%s2024_s16 + $0x38] sm:$0xff] }
  0x37   : > { %v748_v24 = vld [vmem:[%s2019_s25 + $0x10] sm:$0xff]  ;;  %v746_v25 = vld [vmem:[%s2019_s25] sm:$0xff]  ;;  %v749_v28 = vld [vmem:[%s2019_s25 + $0x18] sm:$0xff] }
  0x38   : > { %584 = vmatpush.msra.mxu0 %v571_v5  ;;  %771 = vperm.xlu1 %1608, %v748_v24   ;;  %v747_v29 = vld [vmem:[%s2019_s25 + $0x8] sm:$0xff]  ;;  %v552_v30 = vld [vmem:[%s2024_s16 + $0x40] sm:$0xff]  ;;  %v676_v31 = vld [vmem:[#allocation8 + $0x78] sm:$0xff] }
  0x39   : > { %765 = vperm.xlu0 %1607, %v746_v25   ;;  %v752_v32 = vld [vmem:[%s2019_s25 + $0x30] sm:$0xff]  ;;  %681 = vmatpush.msra.mxu1 %v676_v31  ;;  %v674_v34 = vld [vmem:[#allocation8 + $0x68] sm:$0xff]  ;;  %v673_v36 = vld [vmem:[#allocation8 + $0x60] sm:$0xff] }
  0x3a   : > { %585 = vmatpush.msra.mxu0 %v570_v6  ;;  %v675_v33 = vld [vmem:[#allocation8 + $0x70] sm:$0xff]  ;;  %v553_v35 = vld [vmem:[%s2024_s16 + $0x48] sm:$0xff]  ;;  %v672_v37 = vld [vmem:[#allocation8 + $0x58] sm:$0xff] }
  0x3b   : > { %682 = vmatpush.msra.mxu1 %v675_v33  ;;  %v750_v38 = vld [vmem:[%s2019_s25 + $0x20] sm:$0xff]  ;;  %v753_v39 = vld [vmem:[%s2019_s25 + $0x38] sm:$0xff]  ;;  %v755_v40 = vld [vmem:[%s2019_s25 + $0x48] sm:$0xff] }
  0x3c   : > { %586 = vmatpush.msra.mxu0 %v569_v7  ;;  %777 = vperm.xlu2 %1609, %v750_v38   ;;  %v671_v41 = vld [vmem:[#allocation8 + $0x50] sm:$0xff]  ;;  %v670_v42 = vld [vmem:[#allocation8 + $0x48] sm:$0xff]  ;;  %v669_v44 = vld [vmem:[#allocation8 + $0x40] sm:$0xff] }
  0x3d   : > { %683 = vmatpush.msra.mxu1 %v674_v34  ;;  %v554_v43 = vld [vmem:[%s2024_s16 + $0x50] sm:$0xff]  ;;  %v668_v45 = vld [vmem:[#allocation8 + $0x38] sm:$0xff]  ;;  %v751_v46 = vld [vmem:[%s2019_s25 + $0x28] sm:$0xff] }
  0x3e   : > { %587 = vmatpush.msra.mxu0 %v568_v8  ;;  %v756_v47 = vld [vmem:[%s2019_s25 + $0x50] sm:$0xff]  ;;  %v758_v48 = vld [vmem:[%s2019_s25 + $0x60] sm:$0xff]  ;;  %v666_v50 = vld [vmem:[#allocation8 + $0x28] sm:$0xff] }
  0x3f   : > { %684 = vmatpush.msra.mxu1 %v673_v36  ;;  %v667_v49 = vld [vmem:[#allocation8 + $0x30] sm:$0xff]  ;;  %v555_v51 = vld [vmem:[%s2024_s16 + $0x58] sm:$0xff]  ;;  %v665_v52 = vld [vmem:[#allocation8 + $0x20] sm:$0xff] }
  0x40   : > { %588 = vmatpush.msra.mxu0 %v567_v9  ;;  %774 = vperm.xlu1 %1608, %v749_v28   ;;  %v664_v53 = vld [vmem:[#allocation8 + $0x18] sm:$0xff]  ;;  %v754_v54 = vld [vmem:[%s2019_s25 + $0x40] sm:$0xff]  ;;  %v759_v55 = vld [vmem:[%s2019_s25 + $0x68] sm:$0xff] }
  0x41   : > { %768 = vperm.xlu0 %1607, %v747_v29   ;;  %685 = vmatpush.msra.mxu1 %v672_v37  ;;  %v663_v56 = vld [vmem:[#allocation8 + $0x10] sm:$0xff]  ;;  %v556_v57 = vld [vmem:[%s2024_s16 + $0x60] sm:$0xff]  ;;  %v662_v58 = vld [vmem:[#allocation8 + $0x8] sm:$0xff] }
  0x42   : > { %589 = vmatpush.msra.mxu0 %v566_v10  ;;  %v661_v59 = vld [vmem:[#allocation8] sm:$0xff]  ;;  %v757_v60 = vld [vmem:[%s2019_s25 + $0x58] sm:$0xff]  ;;  %v557_v61 = vld [vmem:[%s2024_s16 + $0x68] sm:$0xff] }
  0x43   : > { %686 = vmatpush.msra.mxu1 %v671_v41  ;;  %v761_v62 = vld [vmem:[%s2019_s25 + $0x78] sm:$0xff]  ;;  %v558_v63 = vld [vmem:[%s2024_s16 + $0x70] sm:$0xff]  ;;  %v2062_v1 = vld [vmem:[%s2214_s5] ss:$0 sm:$0xff] }
  0x44   : > { %590 = vmatpush.msra.mxu0 %v565_v11  ;;  %780 = vperm.xlu2 %1609, %v751_v46   ;;  %v559_v0 = vld [vmem:[%s2024_s16 + $0x78] sm:$0xff]  ;;  %v760_v2 = vld [vmem:[%s2019_s25 + $0x70] sm:$0xff] }
  0x45   : > { %687 = vmatpush.msra.mxu1 %v670_v42  ;;  %v861_v31 = vld [vmem:[#allocation3 + $0x8] sm:$0xff]  ;;  %v860_v36 = vld [vmem:[#allocation3] sm:$0xff] }
  0x46   : > { %591 = vmatpush.msra.mxu0 %v564_v12  ;;  %1486 = vmatpush.msra.mxu2 %v861_v31 }
  0x47   : > { %688 = vmatpush.msra.mxu1 %v669_v44  ;;  %1487 = vmatpush.msra.mxu3 %v861_v31 }
  0x48   : > { %592 = vmatpush.msra.mxu0 %v563_v13  ;;  %786 = vperm.xlu1 %1608, %v753_v39  }
  0x49   : > { %783 = vperm.xlu0 %1607, %v752_v32   ;;  %689 = vmatpush.msra.mxu1 %v668_v45 }
  0x4a   : > { %593 = vmatpush.msra.mxu0 %v562_v14  ;;  %1488 = vmatpush.msra.mxu2 %v860_v36 }
  0x4b   : > { %690 = vmatpush.msra.mxu1 %v667_v49  ;;  %1489 = vmatpush.msra.mxu3 %v860_v36 }
  0x4c   : > { %594 = vmatpush.msra.mxu0 %v561_v15  ;;  %789 = vperm.xlu2 %1609, %v754_v54  }
  0x4d   : > { %691 = vmatpush.msra.mxu1 %v666_v50 }
  0x4e   : > { %595 = vmatpush.msra.mxu0 %v560_v16 }
  0x4f   : > { %596 = vmatmul.f32.vlgmr.msra.gmra.mxu0 %v544_v17  ;;  %692 = vmatpush.msra.mxu1 %v665_v52 }
  0x50   : > { %795 = vperm.xlu1 %1608, %v756_v47  }
  0x51   : > { %792 = vperm.xlu0 %1607, %v755_v40   ;;  %693 = vmatpush.msra.mxu1 %v664_v53 }
  0x53   : > { %694 = vmatpush.msra.mxu1 %v663_v56 }
  0x54   : > { %798 = vperm.xlu2 %1609, %v757_v60  }
  0x55   : > { %695 = vmatpush.msra.mxu1 %v662_v58 }
  0x57   : > { %599 = vmatmul.f32.gmra.mxu0 %v545_v18  ;;  %696 = vmatpush.msra.mxu1 %v661_v59 }
  0x58   : > { %804 = vperm.xlu1 %1608, %v759_v55  }
  0x59   : > { %801 = vperm.xlu0 %1607, %v758_v48   ;;  %925 = vmatpush.msrb.mxu1 %v861_v31 }
  0x5b   : > { %926 = vmatpush.msrb.mxu1 %v860_v36  ;;  %v990_v36 = vld [vmem:[#allocation11 + $0x70] sm:$0xff] }
  0x5c   : > { %807 = vperm.xlu2 %1609, %v760_v2  }
  0x5f   : > { %602 = vmatmul.f32.gmra.mxu0 %v546_v19 }
  0x61   : > { %810 = vperm.xlu0 %1607, %v761_v62  }
  0x67   : > { %605 = vmatmul.f32.gmra.mxu0 %v547_v20 }
  0x6f   : > { %608 = vmatmul.f32.gmra.mxu0 %v548_v21 }
  0x77   : > { %611 = vmatmul.f32.gmra.mxu0 %v549_v22 }
  0x7f   : > { %614 = vmatmul.f32.gmra.mxu0 %v550_v23  ;;  %v762_v23 = vlaneseq }
  0x81   : > { %v2072_v25 = vand.u32 127, %v762_v23 }
  0x87   : > { %617 = vmatmul.f32.gmra.mxu0 %v551_v27  ;;  %v1864_v27 = vmov 0.0  }
  0x8f   : > { %620 = vmatmul.f32.gmra.mxu0 %v552_v30 }
  0x96   : > { %v778_v20 = vpop.permute.xlu2 %777 }
  0x97   : > { %623 = vmatmul.f32.gmra.mxu0 %v553_v35  ;;  %vm816_vm5 = vcmp.eq.s32.totalorder %v2072_v25, %v778_v20 }
  0x98   : > { %v1449_v41 = vsel %vm816_vm5, 1.0, %v1864_v27 }
  0x9e   : > { %v781_v32 = vpop.permute.xlu2 %780 }
  0x9f   : > { %626 = vmatmul.f32.gmra.mxu0 %v554_v43  ;;  %vm817_vm6 = vcmp.eq.s32.totalorder %v2072_v25, %v781_v32 }
  0xa0   : > { %v1450_v47 = vsel %vm817_vm6, 1.0, %v1864_v27 }
  0xa6   : > { %v790_v42 = vpop.permute.xlu2 %789 }
  0xa7   : > { %629 = vmatmul.f32.gmra.mxu0 %v555_v51  ;;  %vm820_vm12 = vcmp.eq.s32.totalorder %v2072_v25, %v790_v42  ;;  %v984_v42 = vld [vmem:[#allocation11 + $0x40] sm:$0xff] }
  0xaa   : > { %v772_v21 = vpop.permute.xlu1 %771 }
  0xab   : > { %v766_v24 = vpop.permute.xlu0 %765  ;;  %vm814_vm0 = vcmp.eq.s32.totalorder %v2072_v25, %v772_v21 }
  0xac   : > { %vm812_vm1 = vcmp.eq.s32.totalorder %v2072_v25, %v766_v24  ;;  %v2077_v28 = vsel %vm814_vm0, 1.0, %v1864_v27 }
  0xad   : > { %v2080_v29 = vsel %vm812_vm1, 1.0, %v1864_v27 }
  0xae   : > { %v799_v48 = vpop.permute.xlu2 %798 }
  0xaf   : > { %632 = vmatmul.f32.gmra.mxu0 %v556_v57  ;;  %vm823_vm7 = vcmp.eq.s32.totalorder %v2072_v25, %v799_v48 }
  0xb0   : > { %v1456_v52 = vsel %vm823_vm7, 1.0, %v1864_v27 }
  0xb1   : > { %1472 = vmatmul.msk.f32.vlgmr.msra.gmra.mxu3 %vm862_vm4, %v1456_v52  ;;  %v976_v52 = vld [vmem:[#allocation11] sm:$0xff] }
  0xb2   : > { %v775_v33 = vpop.permute.xlu1 %774 }
  0xb3   : > { %vm815_vm2 = vcmp.eq.s32.totalorder %v2072_v25, %v775_v33  ;;  %v769_v35 = vpop.permute.xlu0 %768 }
  0xb4   : > { %v1448_v37 = vsel %vm815_vm2, 1.0, %v1864_v27  ;;  %vm813_vm3 = vcmp.eq.s32.totalorder %v2072_v25, %v769_v35  ;;  %v991_v35 = vld [vmem:[#allocation11 + $0x78] sm:$0xff] }
  0xb5   : > { %v2087_v38 = vsel %vm813_vm3, 1.0, %v1864_v27  ;;  %1464 = vmatmul.msk.f32.vlgmr.msra.gmra.mxu2 %vm862_vm4, %v1448_v37  ;;  %992 = vmatpush.msrb.mxu3 %v991_v35  ;;  %v989_v37 = vld [vmem:[#allocation11 + $0x68] sm:$0xff] }
  0xb7   : > { %635 = vmatmul.f32.gmra.mxu0 %v557_v61  ;;  %993 = vmatpush.msrb.mxu3 %v990_v36  ;;  %v1611_v36 = vld [vmem:[%s2216_s7] ss:$0 sm:$0xff] }
  0xb9   : > { %994 = vmatpush.msrb.mxu3 %v989_v37 }
  0xba   : > { %v787_v49 = vpop.permute.xlu1 %786 }
  0xbb   : > { %v784_v44 = vpop.permute.xlu0 %783  ;;  %vm819_vm10 = vcmp.eq.s32.totalorder %v2072_v25, %v787_v49  ;;  %v979_v49 = vld [vmem:[#allocation11 + $0x18] sm:$0xff] }
  0xbc   : > { %vm818_vm8 = vcmp.eq.s32.totalorder %v2072_v25, %v784_v44  ;;  %v1452_v62 = vsel %vm819_vm10, 1.0, %v1864_v27  ;;  %v983_v44 = vld [vmem:[#allocation11 + $0x38] sm:$0xff] }
  0xbd   : > { %1465 = vmatmul.msk.f32.gmra.mxu2 %vm862_vm4, %v1449_v41  ;;  %v1451_v55 = vsel %vm818_vm8, 1.0, %v1864_v27  ;;  %v985_v41 = vld [vmem:[#allocation11 + $0x48] sm:$0xff] }
  0xbf   : > { %638 = vmatmul.f32.gmra.mxu0 %v558_v63 }
  0xc2   : > { %v796_v56 = vpop.permute.xlu1 %795 }
  0xc3   : > { %v793_v51 = vpop.permute.xlu0 %792  ;;  %vm822_vm0 = vcmp.eq.s32.totalorder %v2072_v25, %v796_v56 }
  0xc4   : > { %vm821_vm14 = vcmp.eq.s32.totalorder %v2072_v25, %v793_v51  ;;  %v977_v51 = vld [vmem:[#allocation11 + $0x8] sm:$0xff] }
  0xc5   : > { %1466 = vmatmul.msk.f32.gmra.mxu2 %vm862_vm4, %v1450_v47  ;;  %v980_v47 = vld [vmem:[#allocation11 + $0x20] sm:$0xff] }
  0xc7   : > { %641 = vmatmul.f32.gmra.mxu0 %v559_v0 }
  0xca   : > { %v805_v63 = vpop.permute.xlu1 %804 }
  0xcb   : > { %v802_v58 = vpop.permute.xlu0 %801  ;;  %vm825_vm11 = vcmp.eq.s32.totalorder %v2072_v25, %v805_v63 }
  0xcc   : > { %v597_v3 = vpop.f32.mrf.mxu0  ;;  %vm824_vm9 = vcmp.eq.s32.totalorder %v2072_v25, %v802_v58  ;;  %v1458_v2 = vsel %vm825_vm11, 1.0, %v1864_v27 }
  0xcd   : > { %v598_v4 = vadd.f32 %v2062_v1, %v597_v3  ;;  %v1457_v59 = vsel %vm824_vm9, 1.0, %v1864_v27  ;;  %1467 = vmatmul.msk.f32.gmra.mxu2 %vm862_vm4, %v1451_v55 }
  0xce   : > { %1473 = vmatmul.msk.f32.gmra.mxu3 %vm862_vm4, %v1457_v59 }
  0xcf   : > { %v645_v5 = vmax.f32 %v598_v4, 0.0 }
  0xd1   : > { %697 = vmatmul.f32.vlgmr.msra.gmra.mxu1 %v645_v5  ;;  %v1453_v5 = vsel %vm820_vm12, 1.0, %v1864_v27 }
  0xd4   : > { %v600_v6 = vpop.f32.mrf.mxu0 }
  0xd5   : > { %v601_v7 = vadd.f32 %v2062_v1, %v600_v6  ;;  %1468 = vmatmul.msk.f32.gmra.mxu2 %vm862_vm4, %v1452_v62  ;;  %v808_v6 = vpop.permute.xlu2 %807 }
  0xd6   : > { %1474 = vmatmul.msk.f32.gmra.mxu3 %vm862_vm4, %v1458_v2  ;;  %vm826_vm13 = vcmp.eq.s32.totalorder %v2072_v25, %v808_v6  ;;  %v1086_v6 = vld [vmem:[#allocation12 + $0x68] sm:$0xff] }
  0xd7   : > { %v646_v8 = vmax.f32 %v601_v7, 0.0 }
  0xd9   : > { %700 = vmatmul.f32.gmra.mxu1 %v646_v8  ;;  %v1459_v8 = vsel %vm826_vm13, 1.0, %v1864_v27 }
  0xdc   : > { %v603_v9 = vpop.f32.mrf.mxu0 }
  0xdd   : > { %v604_v10 = vadd.f32 %v2062_v1, %v603_v9  ;;  %1469 = vmatmul.msk.f32.gmra.mxu2 %vm862_vm4, %v1453_v5  ;;  %v1087_v5 = vld [vmem:[#allocation12 + $0x70] sm:$0xff] }
  0xde   : > { %1475 = vmatmul.msk.f32.gmra.mxu3 %vm862_vm4, %v1459_v8  ;;  %v1084_v8 = vld [vmem:[#allocation12 + $0x58] sm:$0xff] }
  0xdf   : > { %v647_v11 = vmax.f32 %v604_v10, 0.0  ;;  %v811_v10 = vpop.permute.xlu0 %810 }
  0xe0   : > { %vm827_vm15 = vcmp.eq.s32.totalorder %v2072_v25, %v811_v10 }
  0xe1   : > { %703 = vmatmul.f32.gmra.mxu1 %v647_v11 }
  0xe4   : > { %v606_v12 = vpop.f32.mrf.mxu0 }
  0xe5   : > { %v607_v13 = vadd.f32 %v2062_v1, %v606_v12  ;;  %v1454_v12 = vsel %vm821_vm14, 1.0, %v1864_v27 }
  0xe6   : > { %1470 = vmatmul.msk.f32.gmra.mxu2 %vm862_vm4, %v1454_v12  ;;  %v1082_v12 = vld [vmem:[#allocation12 + $0x48] sm:$0xff] }
  0xe7   : > { %v648_v14 = vmax.f32 %v607_v13, 0.0 }
  0xe9   : > { %706 = vmatmul.f32.gmra.mxu1 %v648_v14  ;;  %v1460_v14 = vsel %vm827_vm15, 1.0, %v1864_v27 }
  0xea   : > { %1476 = vmatmul.msk.f32.gmra.mxu3 %vm862_vm4, %v1460_v14  ;;  %v1080_v14 = vld [vmem:[#allocation12 + $0x38] sm:$0xff] }
  0xec   : > { %v609_v15 = vpop.f32.mrf.mxu0 }
  0xed   : > { %v610_v16 = vadd.f32 %v2062_v1, %v609_v15 }
  0xef   : > { %v649_v17 = vmax.f32 %v610_v16, 0.0 }
  0xf1   : > { %709 = vmatmul.f32.gmra.mxu1 %v649_v17  ;;  %v1455_v17 = vsel %vm822_vm0, 1.0, %v1864_v27 }
  0xf2   : > { %1471 = vmatmul.msk.f32.gmra.mxu2 %vm862_vm4, %v1455_v17 }
  0xf4   : > { %v612_v18 = vpop.f32.mrf.mxu0 }
  0xf5   : > { %v613_v19 = vadd.f32 %v2062_v1, %v612_v18 }
  0xf7   : > { %v650_v22 = vmax.f32 %v613_v19, 0.0 }
  0xf9   : > { %712 = vmatmul.f32.gmra.mxu1 %v650_v22 }
  0xfc   : > { %v615_v26 = vpop.f32.mrf.mxu0 }
  0xfd   : > { %v616_v30 = vadd.f32 %v2062_v1, %v615_v26 }
  0xff   : > { %v651_v34 = vmax.f32 %v616_v30, 0.0 }
 0x101   : > { %715 = vmatmul.f32.gmra.mxu1 %v651_v34 }
 0x104   : > { %v618_v39 = vpop.f32.mrf.mxu0 }
 0x105   : > { %v619_v40 = vadd.f32 %v2062_v1, %v618_v39  ;;  %v987_v39 = vld [vmem:[#allocation11 + $0x58] sm:$0xff] }
 0x107   : > { %v652_v43 = vmax.f32 %v619_v40, 0.0  ;;  %v986_v40 = vld [vmem:[#allocation11 + $0x50] sm:$0xff] }
 0x109   : > { %718 = vmatmul.f32.gmra.mxu1 %v652_v43 }
 0x10c   : > { %v621_v45 = vpop.f32.mrf.mxu0 }
 0x10d   : > { %v622_v46 = vadd.f32 %v2062_v1, %v621_v45  ;;  %v982_v45 = vld [vmem:[#allocation11 + $0x30] sm:$0xff] }
 0x10f   : > { %v653_v50 = vmax.f32 %v622_v46, 0.0  ;;  %v981_v46 = vld [vmem:[#allocation11 + $0x28] sm:$0xff] }
 0x111   : > { %721 = vmatmul.f32.gmra.mxu1 %v653_v50  ;;  %v978_v50 = vld [vmem:[#allocation11 + $0x10] sm:$0xff] }
 0x114   : > { %v624_v53 = vpop.f32.mrf.mxu0 }
 0x115   : > { %v625_v54 = vadd.f32 %v2062_v1, %v624_v53 }
 0x117   : > { %v654_v57 = vmax.f32 %v625_v54, 0.0 }
 0x119   : > { %724 = vmatmul.f32.gmra.mxu1 %v654_v57 }
 0x11c   : > { %v627_v60 = vpop.f32.mrf.mxu0 }
 0x11d   : > { %v628_v61 = vadd.f32 %v2062_v1, %v627_v60 }
 0x11f   : > { %v655_v0 = vmax.f32 %v628_v61, 0.0 }
 0x121   : > { %727 = vmatmul.f32.gmra.mxu1 %v655_v0 }
 0x124   : > { %v630_v3 = vpop.f32.mrf.mxu0 }
 0x125   : > { %v631_v4 = vadd.f32 %v2062_v1, %v630_v3  ;;  %v1088_v3 = vld [vmem:[#allocation12 + $0x78] sm:$0xff] }
 0x126   : > { %1089 = vmatpush.msrb.mxu2 %v1088_v3 }
 0x127   : > { %v656_v7 = vmax.f32 %v631_v4, 0.0 }
 0x128   : > { %1090 = vmatpush.msrb.mxu2 %v1087_v5 }
 0x129   : > { %730 = vmatmul.f32.gmra.mxu1 %v656_v7  ;;  %v1085_v7 = vld [vmem:[#allocation12 + $0x60] sm:$0xff] }
 0x12a   : > { %1091 = vmatpush.msrb.mxu2 %v1086_v6 }
 0x12c   : > { %v633_v9 = vpop.f32.mrf.mxu0  ;;  %1092 = vmatpush.msrb.mxu2 %v1085_v7 }
 0x12d   : > { %v634_v11 = vadd.f32 %v2062_v1, %v633_v9 }
 0x12e   : > { %1093 = vmatpush.msrb.mxu2 %v1084_v8 }
 0x12f   : > { %v657_v13 = vmax.f32 %v634_v11, 0.0  ;;  %v1083_v11 = vld [vmem:[#allocation12 + $0x50] sm:$0xff] }
 0x130   : > { %1094 = vmatpush.msrb.mxu2 %v1083_v11 }
 0x131   : > { %733 = vmatmul.f32.gmra.mxu1 %v657_v13  ;;  %v1081_v13 = vld [vmem:[#allocation12 + $0x40] sm:$0xff] }
 0x132   : > { %1095 = vmatpush.msrb.mxu2 %v1082_v12 }
 0x134   : > { %v636_v15 = vpop.f32.mrf.mxu0  ;;  %v961_v9 = vpop.f32.mrf.mxu3  ;;  %1096 = vmatpush.msrb.mxu2 %v1081_v13 }
 0x135   : > { %v637_v16 = vadd.f32 %v2062_v1, %v636_v15  ;;  %v1079_v15 = vld [vmem:[#allocation12 + $0x30] sm:$0xff] }
 0x136   : > { %1097 = vmatpush.msrb.mxu2 %v1080_v14 }
 0x137   : > { %v658_v18 = vmax.f32 %v637_v16, 0.0  ;;  %v1078_v16 = vld [vmem:[#allocation12 + $0x28] sm:$0xff] }
 0x138   : > { %v937_v59 = vpop.f32.mrf.mxu2  ;;  %1098 = vmatpush.msrb.mxu2 %v1079_v15 }
 0x139   : > { %736 = vmatmul.f32.gmra.mxu1 %v658_v18  ;;  %v1077_v18 = vld [vmem:[#allocation12 + $0x20] sm:$0xff] }
 0x13a   : > { %1099 = vmatpush.msrb.mxu2 %v1078_v16 }
 0x13c   : > { %v639_v19 = vpop.f32.mrf.mxu0  ;;  %1100 = vmatpush.msrb.mxu2 %v1077_v18 }
 0x13d   : > { %v640_v20 = vadd.f32 %v2062_v1, %v639_v19  ;;  %v1076_v19 = vld [vmem:[#allocation12 + $0x18] sm:$0xff] }
 0x13e   : > { %1101 = vmatpush.msrb.mxu2 %v1076_v19 }
 0x13f   : > { %v659_v21 = vmax.f32 %v640_v20, 0.0  ;;  %v1075_v20 = vld [vmem:[#allocation12 + $0x10] sm:$0xff] }
 0x140   : > { %v940_v61 = vpop.f32.mrf.mxu2  ;;  %1102 = vmatpush.msrb.mxu2 %v1075_v20 }
 0x141   : > { %739 = vmatmul.f32.gmra.mxu1 %v659_v21  ;;  %v1074_v21 = vld [vmem:[#allocation12 + $0x8] sm:$0xff] }
 0x142   : > { %1103 = vmatpush.msrb.mxu2 %v1074_v21 }
 0x144   : > { %v642_v22 = vpop.f32.mrf.mxu0 }
 0x145   : > { %v643_v24 = vadd.f32 %v2062_v1, %v642_v22 }
 0x147   : > { %v660_v26 = vmax.f32 %v643_v24, 0.0  ;;  %v1073_v24 = vld [vmem:[#allocation12] sm:$0xff] }
 0x148   : > { %v943_v62 = vpop.f32.mrf.mxu2  ;;  %1104 = vmatpush.msrb.mxu2 %v1073_v24 }
 0x149   : > { %742 = vmatmul.f32.gmra.mxu1 %v660_v26 }
 0x14e   : > { %v2135_v25 = vpop.f32.mrf.mxu1 }
 0x14f   : > { %v699_v37 = vadd.f32 %v1611_v36, %v2135_v25 }
 0x150   : > { %v946_v63 = vpop.f32.mrf.mxu2 }
 0x151   : > { %1461 = vmatmul.msk.f32.vlgmr.msrb.gmra.mxu1 %vm862_vm4, %v2080_v29  ;;  %v964_v17 = vpop.f32.mrf.mxu3 }
 0x156   : > { %v2139_v27 = vpop.f32.mrf.mxu1 }
 0x158   : > { %v949_v0 = vpop.f32.mrf.mxu2 }
 0x159   : > { %1462 = vmatmul.msk.f32.gmra.mxu1 %vm862_vm4, %v2087_v38  ;;  %v988_v38 = vld [vmem:[#allocation11 + $0x60] sm:$0xff]  ;;  %v967_v22 = vpop.f32.mrf.mxu3 }
 0x15a   : > { %995 = vmatpush.msrb.mxu3 %v988_v38 }
 0x15c   : > { %996 = vmatpush.msrb.mxu3 %v987_v39 }
 0x15e   : > { %v2143_v30 = vpop.f32.mrf.mxu1  ;;  %997 = vmatpush.msrb.mxu3 %v986_v40  ;;  %v702_v40 = vadd.f32 %v1611_v36, %v2139_v27 }
 0x160   : > { %998 = vmatpush.msrb.mxu3 %v985_v41  ;;  %v952_v2 = vpop.f32.mrf.mxu2 }
 0x161   : > { %1463 = vmatmul.msk.f32.gmra.mxu1 %vm862_vm4, %v2077_v28  ;;  %v970_v26 = vpop.f32.mrf.mxu3 }
 0x162   : > { %999 = vmatpush.msrb.mxu3 %v984_v42 }
 0x164   : > { %1000 = vmatpush.msrb.mxu3 %v983_v44  ;;  %v705_v44 = vadd.f32 %v1611_v36, %v2143_v30 }
 0x166   : > { %v2147_v31 = vpop.f32.mrf.mxu1  ;;  %1001 = vmatpush.msrb.mxu3 %v982_v45 }
 0x168   : > { %1002 = vmatpush.msrb.mxu3 %v981_v46 }
 0x169   : > { %v955_v4 = vpop.f32.mrf.mxu2 }
 0x16a   : > { %1003 = vmatpush.msrb.mxu3 %v980_v47  ;;  %v708_v47 = vadd.f32 %v1611_v36, %v2147_v31 }
 0x16c   : > { %1004 = vmatpush.msrb.mxu3 %v979_v49 }
 0x16d   : > { %v973_v35 = vpop.f32.mrf.mxu3 }
 0x16e   : > { %v2149_v1 = vpop.f32.mrf.mxu1  ;;  %1005 = vmatpush.msrb.mxu3 %v978_v50 }
 0x16f   : > { %v711_v25 = vadd.f32 %v1611_v36, %v2149_v1 }
 0x170   : > { %1006 = vmatpush.msrb.mxu3 %v977_v51 }
 0x172   : > { %1007 = vmatpush.msrb.mxu3 %v976_v52 }
 0x174   : > { %1490 = vmatpush.msra.mxu3 %v1088_v3 }
 0x175   : > { %v958_v10 = vpop.f32.mrf.mxu2 }
 0x176   : > { %v2151_v32 = vpop.f32.mrf.mxu1  ;;  %1491 = vmatpush.msra.mxu3 %v1087_v5 }
 0x177   : > { %v714_v27 = vadd.f32 %v1611_v36, %v2151_v32 }
 0x178   : > { %1492 = vmatpush.msra.mxu3 %v1086_v6 }
 0x17a   : > { %1493 = vmatpush.msra.mxu3 %v1085_v7 }
 0x17c   : > { %1494 = vmatpush.msra.mxu3 %v1084_v8 }
 0x17e   : > { %v2153_v33 = vpop.f32.mrf.mxu1  ;;  %1495 = vmatpush.msra.mxu3 %v1083_v11 }
 0x17f   : > { %v717_v30 = vadd.f32 %v1611_v36, %v2153_v33 }
 0x180   : > { %1496 = vmatpush.msra.mxu3 %v1082_v12 }
 0x182   : > { %1497 = vmatpush.msra.mxu3 %v1081_v13 }
 0x184   : > { %1498 = vmatpush.msra.mxu3 %v1080_v14 }
 0x186   : > { %v2155_v34 = vpop.f32.mrf.mxu1  ;;  %1499 = vmatpush.msra.mxu3 %v1079_v15 }
 0x187   : > { %v720_v31 = vadd.f32 %v1611_v36, %v2155_v34 }
 0x188   : > { %1500 = vmatpush.msra.mxu3 %v1078_v16 }
 0x18a   : > { %1501 = vmatpush.msra.mxu3 %v1077_v18 }
 0x18c   : > { %1502 = vmatpush.msra.mxu3 %v1076_v19 }
 0x18e   : > { %v2157_v29 = vpop.f32.mrf.mxu1  ;;  %1503 = vmatpush.msra.mxu3 %v1075_v20 }
 0x18f   : > { %v723_v1 = vadd.f32 %v1611_v36, %v2157_v29 }
 0x190   : > { %1504 = vmatpush.msra.mxu3 %v1074_v21 }
 0x192   : > { %1505 = vmatpush.msra.mxu3 %v1073_v24 }
 0x196   : > { %v2159_v28 = vpop.f32.mrf.mxu1 }
 0x197   : > { %v726_v32 = vadd.f32 %v1611_v36, %v2159_v28 }
 0x19e   : > { %v2161_v43 = vpop.f32.mrf.mxu1 }
 0x19f   : > { %v729_v33 = vadd.f32 %v1611_v36, %v2161_v43 }
 0x1a6   : > { %v2163_v48 = vpop.f32.mrf.mxu1 }
 0x1a7   : > { %v732_v34 = vadd.f32 %v1611_v36, %v2163_v48 }
 0x1ae   : > { %v2165_v53 = vpop.f32.mrf.mxu1 }
 0x1af   : > { %v735_v29 = vadd.f32 %v1611_v36, %v2165_v53 }
 0x1b6   : > { %v2167_v54 = vpop.f32.mrf.mxu1 }
 0x1b7   : > { %v738_v28 = vadd.f32 %v1611_v36, %v2167_v54 }
 0x1be   : > { %v2169_v55 = vpop.f32.mrf.mxu1 }
 0x1bf   : > { %v741_v43 = vadd.f32 %v1611_v36, %v2169_v55 }
 0x1c6   : > { %v2171_v56 = vpop.f32.mrf.mxu1 }
 0x1c7   : > { %v744_v48 = vadd.f32 %v1611_v36, %v2171_v56  ;;  %v1156_v36 = vshrl.u32 %v762_v23, 7 }
 0x1ce   : > { %v928_v57 = vpop.f32.mrf.mxu1 }
 0x1cf   : > { %1008 = vmatmul.f32.vlgmr.msrb.gmra.mxu3 %v928_v57 }
 0x1d6   : > { %v931_v58 = vpop.f32.mrf.mxu1 }
 0x1d7   : > { %1011 = vmatmul.f32.gmra.mxu3 %v931_v58 }
 0x1de   : > { %v934_v60 = vpop.f32.mrf.mxu1 }
 0x1df   : > { %1014 = vmatmul.f32.gmra.mxu3 %v934_v60 }
 0x1e7   : > { %1017 = vmatmul.f32.gmra.mxu3 %v937_v59 }
 0x1ef   : > { %1020 = vmatmul.f32.gmra.mxu3 %v940_v61 }
 0x1f7   : > { %1023 = vmatmul.f32.gmra.mxu3 %v943_v62 }
 0x1ff   : > { %1026 = vmatmul.f32.gmra.mxu3 %v946_v63 }
 0x207   : > { %1029 = vmatmul.f32.gmra.mxu3 %v949_v0 }
 0x20f   : > { %1032 = vmatmul.f32.gmra.mxu3 %v952_v2 }
 0x217   : > { %1035 = vmatmul.f32.gmra.mxu3 %v955_v4 }
 0x21f   : > { %1038 = vmatmul.f32.gmra.mxu3 %v958_v10 }
 0x227   : > { %1041 = vmatmul.f32.gmra.mxu3 %v961_v9 }
 0x22f   : > { %1044 = vmatmul.f32.gmra.mxu3 %v964_v17 }
 0x237   : > { %1047 = vmatmul.f32.gmra.mxu3 %v967_v22 }
 0x23f   : > { %1050 = vmatmul.f32.gmra.mxu3 %v970_v26 }
 0x247   : > { %1053 = vmatmul.f32.gmra.mxu3 %v973_v35 }
 0x252   : > { %v1009_v38 = vpop.f32.mrf.mxu3 }
 0x253   : > { %v1057_v39 = vmul.f32 %v1009_v38, %v699_v37 }
 0x255   : > { %1105 = vmatmul.f32.vlgmr.msrb.gmra.mxu2 %v1057_v39  ;;  %v1612_v39 = vld [vmem:[%s531_s23] ss:$0 sm:$0xff] }
 0x256   : > { %vm1159_vm1 = vcmp.eq.s32.totalorder %v1156_v36, %v1612_v39 }
 0x25a   : > { %v1012_v41 = vpop.f32.mrf.mxu3 }
 0x25b   : > { %v1058_v42 = vmul.f32 %v1012_v41, %v702_v40  ;;  %v1865_v40 = vmov 1.0   ;;  %v1157_v41 = vadd.s32 8, %v1156_v36 }
 0x25d   : > { %1108 = vmatmul.f32.gmra.mxu2 %v1058_v42  ;;  %vm1160_vm2 = vcmp.eq.s32.totalorder %v1157_v41, %v1612_v39  ;;  %v1165_v42 = vld [vmem:[#allocation2] sm:$0xff] }
 0x262   : > { %v1015_v45 = vpop.f32.mrf.mxu3 }
 0x263   : > { %v1059_v46 = vmul.f32 %v1015_v45, %v705_v44 }
 0x265   : > { %1111 = vmatmul.f32.gmra.mxu2 %v1059_v46  ;;  %v1166_v46 = vld [vmem:[#allocation2 + $0x8] sm:$0xff] }
 0x26a   : > { %v1018_v49 = vpop.f32.mrf.mxu3 }
 0x26b   : > { %v1060_v50 = vmul.f32 %v1018_v49, %v708_v47 }
 0x26d   : > { %1114 = vmatmul.f32.gmra.mxu2 %v1060_v50 }
 0x272   : > { %v1021_v51 = vpop.f32.mrf.mxu3 }
 0x273   : > { %v1061_v52 = vmul.f32 %v1021_v51, %v711_v25 }
 0x275   : > { %1117 = vmatmul.f32.gmra.mxu2 %v1061_v52 }
 0x27a   : > { %v1024_v57 = vpop.f32.mrf.mxu3 }
 0x27b   : > { %v1062_v58 = vmul.f32 %v1024_v57, %v714_v27 }
 0x27d   : > { %1120 = vmatmul.f32.gmra.mxu2 %v1062_v58 }
 0x282   : > { %v1027_v59 = vpop.f32.mrf.mxu3 }
 0x283   : > { %v1063_v60 = vmul.f32 %v1027_v59, %v717_v30 }
 0x285   : > { %1123 = vmatmul.f32.gmra.mxu2 %v1063_v60 }
 0x28a   : > { %v1030_v61 = vpop.f32.mrf.mxu3 }
 0x28b   : > { %v1064_v62 = vmul.f32 %v1030_v61, %v720_v31 }
 0x28d   : > { %1126 = vmatmul.f32.gmra.mxu2 %v1064_v62 }
 0x292   : > { %v1033_v63 = vpop.f32.mrf.mxu3 }
 0x293   : > { %v1065_v0 = vmul.f32 %v1033_v63, %v723_v1 }
 0x295   : > { %1129 = vmatmul.f32.gmra.mxu2 %v1065_v0 }
 0x29a   : > { %v1036_v2 = vpop.f32.mrf.mxu3 }
 0x29b   : > { %v1066_v3 = vmul.f32 %v1036_v2, %v726_v32 }
 0x29d   : > { %1132 = vmatmul.f32.gmra.mxu2 %v1066_v3 }
 0x2a2   : > { %v1039_v4 = vpop.f32.mrf.mxu3 }
 0x2a3   : > { %v1067_v5 = vmul.f32 %v1039_v4, %v729_v33 }
 0x2a5   : > { %1135 = vmatmul.f32.gmra.mxu2 %v1067_v5 }
 0x2aa   : > { %v1042_v6 = vpop.f32.mrf.mxu3 }
 0x2ab   : > { %v1068_v7 = vmul.f32 %v1042_v6, %v732_v34 }
 0x2ad   : > { %1138 = vmatmul.f32.gmra.mxu2 %v1068_v7 }
 0x2b2   : > { %v1045_v8 = vpop.f32.mrf.mxu3 }
 0x2b3   : > { %v1069_v9 = vmul.f32 %v1045_v8, %v735_v29 }
 0x2b5   : > { %1141 = vmatmul.f32.gmra.mxu2 %v1069_v9 }
 0x2ba   : > { %v1048_v10 = vpop.f32.mrf.mxu3 }
 0x2bb   : > { %v1070_v11 = vmul.f32 %v1048_v10, %v738_v28 }
 0x2bd   : > { %1144 = vmatmul.f32.gmra.mxu2 %v1070_v11 }
 0x2c2   : > { %v1051_v12 = vpop.f32.mrf.mxu3 }
 0x2c3   : > { %v1071_v13 = vmul.f32 %v1051_v12, %v741_v43 }
 0x2c5   : > { %1147 = vmatmul.f32.gmra.mxu2 %v1071_v13 }
 0x2ca   : > { %v1054_v14 = vpop.f32.mrf.mxu3 }
 0x2cb   : > { %v1072_v15 = vmul.f32 %v1054_v14, %v744_v48 }
 0x2cd   : > { %1150 = vmatmul.f32.vlgmr.msra.gmra.mxu3 %v1072_v15 }
 0x2d8   : > { %v1106_v16 = vpop.f32.mrf.mxu2 }
 0x2e0   : > { %v1109_v53 = vpop.f32.mrf.mxu2 }
 0x2e8   : > { %v1112_v17 = vpop.f32.mrf.mxu2 }
 0x2f0   : > { %v1115_v18 = vpop.f32.mrf.mxu2 }
 0x2f8   : > { %v1118_v19 = vpop.f32.mrf.mxu2 }
 0x300   : > { %v1121_v20 = vpop.f32.mrf.mxu2 }
 0x308   : > { %v1124_v54 = vpop.f32.mrf.mxu2 }
 0x310   : > { %v1127_v21 = vpop.f32.mrf.mxu2 }
 0x318   : > { %v1130_v22 = vpop.f32.mrf.mxu2 }
 0x320   : > { %v1133_v24 = vpop.f32.mrf.mxu2 }
 0x328   : > { %v1136_v26 = vpop.f32.mrf.mxu2 }
 0x330   : > { %v1139_v55 = vpop.f32.mrf.mxu2 }
 0x338   : > { %v1142_v35 = vpop.f32.mrf.mxu2 }
 0x340   : > { %v1145_v37 = vpop.f32.mrf.mxu2 }
 0x348   : > { %v1148_v56 = vpop.f32.mrf.mxu2 }
 0x350   : > { %v1151_v38 = vpop.f32.mrf.mxu3 }
 0x351   : > { %1167 = vmatpush.msrb.mxu0 %v1151_v38 }
 0x353   : > { %1168 = vmatpush.msrb.mxu0 %v1148_v56 }
 0x355   : > { %1169 = vmatpush.msrb.mxu0 %v1145_v37 }
 0x357   : > { %1170 = vmatpush.msrb.mxu0 %v1142_v35 }
 0x359   : > { %1171 = vmatpush.msrb.mxu0 %v1139_v55 }
 0x35b   : > { %1172 = vmatpush.msrb.mxu0 %v1136_v26 }
 0x35d   : > { %1173 = vmatpush.msrb.mxu0 %v1133_v24 }
 0x35f   : > { %1174 = vmatpush.msrb.mxu0 %v1130_v22 }
 0x361   : > { %1175 = vmatpush.msrb.mxu0 %v1127_v21 }
 0x363   : > { %1176 = vmatpush.msrb.mxu0 %v1124_v54 }
 0x365   : > { %1177 = vmatpush.msrb.mxu0 %v1121_v20 }
 0x367   : > { %1178 = vmatpush.msrb.mxu0 %v1118_v19 }
 0x369   : > { %1179 = vmatpush.msrb.mxu0 %v1115_v18 }
 0x36b   : > { %1180 = vmatpush.msrb.mxu0 %v1112_v17 }
 0x36d   : > { %1181 = vmatpush.msrb.mxu0 %v1109_v53 }
 0x36f   : > { %1182 = vmatpush.msrb.mxu0 %v1106_v16 }
 0x370   : > { %1479 = vmatmul.msk.f32.vlgmr.msrb.gmra.mxu0 %vm1159_vm1, %v1865_v40 }
 0x378   : > { %1480 = vmatmul.msk.f32.gmra.mxu0 %vm1160_vm2, %v1865_v40 }
 0x3ed   : > { %v1184_v44 = vpop.f32.mrf.mxu0 }
 0x3ee   : > { %v1190_v45 = vadd.f32 %v1184_v44, %v1165_v42 }
 0x3f0   : > { %1192 = vst [vmem:[#allocation2] sm:$0xff] %v1190_v45 }
 0x3f4   : > { %1197 = sbr.rel (%p1481_p9) target bundleno = 1241 (0x4d9), region = 100 }
 0x3f5   : > { %v1187_v23 = vpop.f32.mrf.mxu0 }
 0x3f6   : > { %v1191_v47 = vadd.f32 %v1187_v23, %v1166_v46 }
 0x3f8   : > { %1193 = vst [vmem:[#allocation2 + $0x8] sm:$0xff] %v1191_v47 }
 0x3f9   : > { %v1217_v49 = vld [vmem:[#allocation9 + $0x78] sm:$0xff]  ;;  %v1216_v50 = vld [vmem:[#allocation9 + $0x70] sm:$0xff]  ;;  %v1215_v25 = vld [vmem:[#allocation9 + $0x68] sm:$0xff]  ;;  %v1866_v2 = vmov 16.0  }
 0x3fa   : > { %1218 = vmatpush.msra.mxu0 %v1217_v49  ;;  %1506 = vmatpush.msra.mxu1 %v1217_v49  ;;  %v1214_v51 = vld [vmem:[#allocation9 + $0x60] sm:$0xff]  ;;  %v1213_v52 = vld [vmem:[#allocation9 + $0x58] sm:$0xff]  ;;  %v1212_v27 = vld [vmem:[#allocation9 + $0x50] sm:$0xff]  ;;  %1614 = vrcp.f32 %v1866_v2 }
 0x3fb   : > { %v1211_v57 = vld [vmem:[#allocation9 + $0x48] sm:$0xff]  ;;  %v1210_v58 = vld [vmem:[#allocation9 + $0x40] sm:$0xff]  ;;  %v1209_v30 = vld [vmem:[#allocation9 + $0x38] sm:$0xff] }
 0x3fc   : > { %1219 = vmatpush.msra.mxu0 %v1216_v50  ;;  %1507 = vmatpush.msra.mxu1 %v1216_v50  ;;  %v1208_v59 = vld [vmem:[#allocation9 + $0x30] sm:$0xff]  ;;  %v1207_v60 = vld [vmem:[#allocation9 + $0x28] sm:$0xff]  ;;  %v1206_v31 = vld [vmem:[#allocation9 + $0x20] sm:$0xff] }
 0x3fd   : > { %v1205_v61 = vld [vmem:[#allocation9 + $0x18] sm:$0xff]  ;;  %v1204_v62 = vld [vmem:[#allocation9 + $0x10] sm:$0xff]  ;;  %v1203_v1 = vld [vmem:[#allocation9 + $0x8] sm:$0xff] }
 0x3fe   : > { %1220 = vmatpush.msra.mxu0 %v1215_v25  ;;  %1508 = vmatpush.msra.mxu1 %v1215_v25  ;;  %v1202_v63 = vld [vmem:[#allocation9] sm:$0xff]  ;;  %v1200_v0 = vld [vmem:[#allocation3] sm:$0xff]  ;;  %v1201_v32 = vld [vmem:[#allocation3 + $0x8] sm:$0xff] }
 0x3ff   : > { %v1198_v33 = vld [vmem:[#allocation2] sm:$0xff]  ;;  %v1199_v4 = vld [vmem:[#allocation2 + $0x8] sm:$0xff] }
 0x400   : > { %1221 = vmatpush.msra.mxu0 %v1214_v51  ;;  %1509 = vmatpush.msra.mxu1 %v1214_v51  ;;  %v1615_v3 = vpop.eup %1614  ;;  %v1613_v5 = vld [vmem:[%s2218_s9] ss:$0 sm:$0xff] }
 0x401   : > { %v1257_v7 = vmul.f32 16.0, %v1615_v3  ;;  %vm1261_vm3 = vweird.f32 %v1615_v3 }
 0x402   : > { %1222 = vmatpush.msra.mxu0 %v1213_v52  ;;  %1510 = vmatpush.msra.mxu1 %v1213_v52 }
 0x403   : > { %v1258_v10 = vsub.f32 1.0, %v1257_v7 }
 0x404   : > { %1223 = vmatpush.msra.mxu0 %v1212_v27  ;;  %1511 = vmatpush.msra.mxu1 %v1212_v27 }
 0x405   : > { %v1259_v12 = vmul.f32 %v1615_v3, %v1258_v10 }
 0x406   : > { %1224 = vmatpush.msra.mxu0 %v1211_v57  ;;  %1512 = vmatpush.msra.mxu1 %v1211_v57 }
 0x407   : > { %v1260_v14 = vadd.f32 %v1615_v3, %v1259_v12 }
 0x408   : > { %1225 = vmatpush.msra.mxu0 %v1210_v58  ;;  %1513 = vmatpush.msra.mxu1 %v1210_v58 }
 0x409   : > { %v1262_v53 = vsel %vm1261_vm3, %v1615_v3, %v1260_v14 }
 0x40a   : > { %1226 = vmatpush.msra.mxu0 %v1209_v30  ;;  %1514 = vmatpush.msra.mxu1 %v1209_v30 }
 0x40c   : > { %1227 = vmatpush.msra.mxu0 %v1208_v59  ;;  %1515 = vmatpush.msra.mxu1 %v1208_v59 }
 0x40e   : > { %1228 = vmatpush.msra.mxu0 %v1207_v60  ;;  %1516 = vmatpush.msra.mxu1 %v1207_v60 }
 0x410   : > { %1229 = vmatpush.msra.mxu0 %v1206_v31  ;;  %1517 = vmatpush.msra.mxu1 %v1206_v31 }
 0x412   : > { %1230 = vmatpush.msra.mxu0 %v1205_v61  ;;  %1518 = vmatpush.msra.mxu1 %v1205_v61 }
 0x414   : > { %1231 = vmatpush.msra.mxu0 %v1204_v62  ;;  %1519 = vmatpush.msra.mxu1 %v1204_v62 }
 0x416   : > { %1232 = vmatpush.msra.mxu0 %v1203_v1  ;;  %1520 = vmatpush.msra.mxu1 %v1203_v1 }
 0x418   : > { %1233 = vmatpush.msra.mxu0 %v1202_v63  ;;  %1521 = vmatpush.msra.mxu1 %v1202_v63 }
 0x419   : > { %1234 = vmatmul.f32.vlgmr.msra.gmra.mxu0 %v1200_v0  ;;  %1237 = vmatmul.f32.vlgmr.msra.gmra.mxu1 %v1201_v32 }
 0x496   : > { %v1235_v34 = vpop.f32.mrf.mxu0  ;;  %v1238_v6 = vpop.f32.mrf.mxu1 }
 0x497   : > { %v1241_v29 = vadd.f32 %v1235_v34, %v1198_v33  ;;  %v1242_v8 = vadd.f32 %v1238_v6, %v1199_v4 }
 0x499   : > { %v1247_v9 = vadd.f32 %v1613_v5, %v1241_v29  ;;  %v1248_v28 = vadd.f32 %v1613_v5, %v1242_v8 }
 0x49b   : > { %v1249_v11 = vadd.f32 %v1248_v28, %v1247_v9 }
 0x49d   : > { %v1250_v43 = vrot.slane %v1249_v11, 4 }
 0x49f   : > { %v1251_v13 = vadd.f32 %v1250_v43, %v1249_v11 }
 0x4a1   : > { %v1252_v48 = vrot.slane %v1251_v13, 2 }
 0x4a3   : > { %v1253_v15 = vadd.f32 %v1252_v48, %v1251_v13 }
 0x4a5   : > { %v1254_v16 = vrot.slane %v1253_v15, 1 }
 0x4a7   : > { %v1255_v17 = vadd.f32 %v1254_v16, %v1253_v15 }
 0x4a9   : > { %v1263_v18 = vmul.f32 %v1262_v53, %v1255_v17 }
 0x4ab   : > { %v1264_v19 = vsub.f32 %v1247_v9, %v1263_v18  ;;  %v1265_v20 = vsub.f32 %v1248_v28, %v1263_v18 }
 0x4ad   : > { %v1266_v54 = vmul.f32 %v1264_v19, %v1264_v19  ;;  %v1267_v21 = vmul.f32 %v1265_v20, %v1265_v20 }
 0x4af   : > { %v1268_v22 = vadd.f32 %v1267_v21, %v1266_v54 }
 0x4b1   : > { %v1269_v24 = vrot.slane %v1268_v22, 4 }
 0x4b3   : > { %v1270_v26 = vadd.f32 %v1269_v24, %v1268_v22 }
 0x4b5   : > { %v1271_v55 = vrot.slane %v1270_v26, 2 }
 0x4b7   : > { %v1272_v35 = vadd.f32 %v1271_v55, %v1270_v26 }
 0x4b9   : > { %v1273_v37 = vrot.slane %v1272_v35, 1 }
 0x4bb   : > { %v1274_v38 = vadd.f32 %v1273_v37, %v1272_v35 }
 0x4bd   : > { %v1275_v56 = vmul.f32 %v1274_v38, %v1262_v53 }
 0x4bf   : > { %v1276_v36 = vadd.f32 1e-05, %v1275_v56 }
 0x4c1   : > { %1616 = vrsqrt.f32 %v1276_v36  ;;  %vm1283_vm5 = vweird.f32 %v1276_v36 }
 0x4c7   : > { %v1617_v39 = vpop.eup %1616 }
 0x4c8   : > { %v1278_v40 = vmul.f32 %v1617_v39, %v1276_v36  ;;  %vm1284_vm4 = vweird.f32 %v1617_v39 }
 0x4c9   : > { %vm1285_vm6 = vmor %vm1283_vm5, %vm1284_vm4 }
 0x4ca   : > { %v1279_v41 = vmul.f32 %v1617_v39, %v1278_v40 }
 0x4cc   : > { %v1280_v42 = vmul.f32 0.5, %v1279_v41 }
 0x4ce   : > { %v1281_v44 = vsub.f32 1.5, %v1280_v42 }
 0x4d0   : > { %v1282_v45 = vmul.f32 %v1617_v39, %v1281_v44 }
 0x4d2   : > { %v1286_v46 = vsel %vm1285_vm6, %v1617_v39, %v1282_v45 }
 0x4d3   : > { %v1287_v23 = vmul.f32 %v1286_v46, %v1264_v19  ;;  %v1288_v47 = vmul.f32 %v1286_v46, %v1265_v20 }
 0x4d5   : > { %v1289_v49 = vmax.f32 %v1287_v23, 0.0  ;;  %v1290_v50 = vmax.f32 %v1288_v47, 0.0 }
 0x4d7   : > { %1291 = vst [vmem:[#allocation14] sm:$0xff] %v1289_v49 }
 0x4d8   : > { %1292 = vst [vmem:[#allocation14 + $0x8] sm:$0xff] %v1290_v50 }
 0x4d9 PF: > { %p1581_p10 = scmp.eq.s32.totalorder %s1941_s22, 1  ;;  %s1867_s20 = smov [#allocation14]  }
 0x4da   : > { %s1298_s23 = sshll.u32 %s1867_s20, 4  ;;  %s1300_s18 = sshll.u32 %s2221_s12, 4  ;;  %s1299_s23 = int_to_ptr.vmem [resolvable:$true] %s1298_s23  ;;  %s1301_s18 = int_to_ptr.hbm [resolvable:$true] %s1300_s18 }
 0x4db   : > { %s1868_s25 = smov 128   ;;  %s1869_s13 = smov 8  }
 0x4dc   : > { %1547 = dma.vmem_to_hbm [thread:$0]  (%p1581_p10), %s1299_s23, 256, %s1301_s18, [#allocation5], %s1868_s25, %s1868_s25, %s1869_s13  }
 0x4dd   : > { %1847 = dma.done.wait (%p1581_p10), [#allocation5], 256  }
 0x4de   : > { %1849 = vsyncadd (%p1581_p10), [#allocation5], 4294967040 }
 0x4df PF: > { %s27_s21 = sadd.s32 1, %s1852_s21  }
 0x4e0   : > { %p24_p11 = scmp.ge.s32.totalorder %s27_s21, 4  }
 0x4e2   :  { %26 = sbr.rel (!%p24_p11) target bundleno = 7 (0x7), region = 134 }
 0x4e7   :  { %1317 = vsyncpa [#allocation4], 1 }
 0x4e8   :  { %1319 = vsyncpa [#allocation4 + $0x1], 1 }
 0x4e9   :  { %1320 = vsyncpa [#allocation7], 1 }
 0x4ea   :  { %1321 = vsyncpa [#allocation10], 1 }
 0x4eb   :  { %1322 = vsyncpa [#allocation13], 1 }
 0x4ec   :  { %1323 = vsyncpa [#allocation5], 1 }
 0x4ed   :  { %1325 = vsyncpa [#allocation5 + $0x1], 1 }

</bundles_post_ra>
